<compile_context>
chip_gen: v7x
topology: tpu7x:2x2x1
jax: 0.10.0
libtpu: 0.0.40
codegen_flags: <defaults>
</compile_context>

<pallas_src>
import functools

import numpy as np
import jax
import jax.numpy as jnp
from jax.experimental import pallas as pl
from jax.experimental.pallas import tpu as pltpu


# ---------------------------------------------------------------------------
# Index-table construction (compile-time constants, cached per n).
# ---------------------------------------------------------------------------
def _recat_indices(n: int) -> np.ndarray:
    """Reproduce the PyTorch fancy-index table: shape (2m+4, 3), m = n - 8."""
    rows = [[0, 1, 2], [3, 4, 5]]
    rows += [[6, 7, i] for i in range(8, n)]
    rows += [[0, 3, 6], [1, 4, 7]]
    rows += [[2, 5, i] for i in range(8, n)]
    return np.asarray(rows, dtype=np.int32)  # (2m+4, 3)


@functools.lru_cache(maxsize=None)
def _recat_tables(n: int):
    """Cached gather tables: flat table, source-sorted table, dest permutation."""
    idx2d = _recat_indices(n)
    g = int(idx2d.shape[0])
    idx_flat = idx2d.reshape(-1).astype(np.int32)                 # (G,)
    order = np.argsort(idx_flat, kind="stable").astype(np.int32)  # dest slots
    src_sorted = idx_flat[order]                                  # (G,) sorted
    return (jnp.asarray(idx_flat), jnp.asarray(src_sorted),
            jnp.asarray(order), g)


# ---------------------------------------------------------------------------
# VMEM sizing helpers.
# ---------------------------------------------------------------------------
_VMEM_HEADROOM = 8 << 20   # leave room for Mosaic internal scratch


def _usable_vmem_bytes() -> int:
    try:
        cap = int(pltpu.get_tpu_info().vmem_capacity_bytes)
    except Exception:
        cap = 64 << 20     # conservative fallback: v7x physical VMEM per TC
    return max(cap - _VMEM_HEADROOM, 16 << 20)


def _pick_chunk(g_total: int, slab_bytes: int, budget_bytes: int,
                max_unroll: int, min_steps: int) -> int:
    """Largest divisor K of g_total with K <= max_unroll, K*slab <= budget and
    g_total // K >= min_steps (so the pipeline actually has steps to overlap)."""
    best = 1
    for k in range(1, min(g_total, max_unroll) + 1):
        if g_total % k:
            continue
        if k * slab_bytes > budget_bytes:
            continue
        if g_total // k < min_steps:
            continue
        best = k
    return best


# ---------------------------------------------------------------------------
# Kernels.
# ---------------------------------------------------------------------------
def _recat_staged_kernel(idx_ref, x_ref, o_ref):
    # idx_ref: (G,) int32 gather table in SMEM (scalar-prefetched).
    # x_ref:   (b, n, s, d) -- full x, VMEM-resident (constant block index).
    # o_ref:   (b, K, s, d) -- output chunk written by this grid step.
    c = pl.program_id(0)
    k_per_step = o_ref.shape[1]
    base = c * k_per_step
    # Static unroll: K is small by construction.  Each copy moves whole
    # (s, d) tiles, so stores are unmasked / lane-dense when d % 128 == 0.
    for k in range(k_per_step):
        src = idx_ref[base + k]
        o_ref[:, k:k + 1, :, :] = x_ref[:, pl.ds(src, 1), :, :]


def _recat_stream_kernel(src_ref, dst_ref, x_ref, o_ref):
    # src_ref/dst_ref are consumed by the index_maps only.
    del src_ref, dst_ref
    o_ref[...] = x_ref[...]


# ---------------------------------------------------------------------------
# pallas_call wrappers.
# ---------------------------------------------------------------------------
def _recat_staged(x, idx_flat, G, slab_bytes, usable_vmem, cost):
    b, n, s, d = x.shape
    x_bytes = n * slab_bytes
    margin = 1 << 20

    # Output-chunk budget = VMEM left after the single-buffered staged x,
    # split across the out chunk's double buffer.
    budget = max(slab_bytes, (usable_vmem - x_bytes - margin) // 2)
    K = _pick_chunk(G, slab_bytes, budget_bytes=budget, max_unroll=64,
                    min_steps=min(4, G))
    num_steps = G // K

    need = x_bytes + 2 * K * slab_bytes + margin
    vmem_limit = int(min(max(need, 16 << 20), usable_vmem))

    grid_spec = pltpu.PrefetchScalarGridSpec(
        num_scalar_prefetch=1,
        grid=(num_steps,),
        in_specs=[
            # Whole x with a constant block index -> DMA'd from HBM once and
            # kept VMEM-resident across all grid steps.  Buffered(1): the
            # block never changes, so the default double buffer is waste.
            pl.BlockSpec((b, n, s, d), lambda c, idx: (0, 0, 0, 0),
                         pipeline_mode=pl.Buffered(1)),
        ],
        out_specs=pl.BlockSpec((b, K, s, d), lambda c, idx: (0, c, 0, 0)),
    )
    return pl.pallas_call(
        _recat_staged_kernel,
        out_shape=jax.ShapeDtypeStruct((b, G, s, d), x.dtype),
        grid_spec=grid_spec,
        compiler_params=pltpu.CompilerParams(
            # "arbitrary": with whole-x staging, a megacore split (v7x) would
            # make both cores DMA their own full copy of x for no benefit.
            dimension_semantics=("arbitrary",),
            vmem_limit_bytes=vmem_limit,
        ),
        cost_estimate=cost,
    )(idx_flat, x)


def _recat_stream(x, src_sorted, dst_perm, G, slab_bytes, usable_vmem, cost):
    b, n, s, d = x.shape
    # Double-buffered input slab + double-buffered output slab + margin.
    need = 4 * slab_bytes + (1 << 20)
    vmem_limit = int(min(max(need, 16 << 20), usable_vmem))
    # TODO(synk): for slabs so large that 4 x (b,1,s,d) exceeds VMEM, also
    # tile the s axis of the streamed blocks.

    grid_spec = pltpu.PrefetchScalarGridSpec(
        num_scalar_prefetch=2,
        grid=(G,),
        in_specs=[
            # Source stream sorted by source index: consecutive steps with the
            # same source block index skip the input re-DMA, so HBM reads stay
            # ~n slabs while only one slab (x2 buffers) lives in VMEM.
            pl.BlockSpec((b, 1, s, d), lambda c, src, dst: (0, src[c], 0, 0)),
        ],
        # Destination permutation scatters each slab to its flat output slot.
        out_specs=pl.BlockSpec((b, 1, s, d), lambda c, src, dst: (0, dst[c], 0, 0)),
    )
    return pl.pallas_call(
        _recat_stream_kernel,
        out_shape=jax.ShapeDtypeStruct((b, G, s, d), x.dtype),
        grid_spec=grid_spec,
        compiler_params=pltpu.CompilerParams(
            # Keep sequential so the sorted-source DMA dedup stays effective.
            dimension_semantics=("arbitrary",),
            vmem_limit_bytes=vmem_limit,
        ),
        cost_estimate=cost,
    )(src_sorted, dst_perm, x)


def recat(x: jax.Array, *, force_stream: bool = False) -> jax.Array:
    b, n, s, d = x.shape
    assert n >= 8, "Recat requires n >= 8"

    idx_flat, src_sorted, dst_perm, g = _recat_tables(n)
    G = 3 * g                                   # flat gather length

    # Lane-dense output stores need d % 128 == 0.  Awkward d stays correct via
    # the pure-JAX gather instead of letting the kernel emit masked stores.
    if d % 128 != 0:
        return recat_ref(x)

    itemsize = jnp.dtype(x.dtype).itemsize
    slab_bytes = b * s * d * itemsize           # one gathered (b, 1, s, d) slab
    x_bytes = n * slab_bytes
    usable_vmem = _usable_vmem_bytes()

    # Purely memory-bound op: read x once, write G slabs.
    cost = pl.CostEstimate(flops=0, transcendentals=0,
                           bytes_accessed=x_bytes + G * slab_bytes)

    staged_fits = (x_bytes + 2 * slab_bytes + (1 << 20)) <= usable_vmem
    if staged_fits and not force_stream:
        out_flat = _recat_staged(x, idx_flat, G, slab_bytes, usable_vmem, cost)
    else:
        out_flat = _recat_stream(x, src_sorted, dst_perm, G, slab_bytes,
                                 usable_vmem, cost)

    # Glue: metadata-only reshape (b, G, s, d) -> (b, 2m+4, 3, s, d).
    return out_flat.reshape(b, g, 3, s, d)


def recat_ref(x: jax.Array) -> jax.Array:
    """Pure-JAX reference (mirrors the PyTorch fancy indexing)."""
    idx2d = jnp.asarray(_recat_indices(x.shape[1]))
    return x[:, idx2d]  # (b, 2m+4, 3, s, d)


if __name__ == "__main__":
    key = jax.random.PRNGKey(0)
    b, n, s, d = 2, 12, 8, 128   # m = 4 -> output (2, 12, 3, 8, 128)
    x = jax.random.normal(key, (b, n, s, d), dtype=jnp.float32)

    ref = recat_ref(x)

    # Staged (whole-x VMEM-resident) path.
    out = jax.block_until_ready(recat(x))
    assert out.shape == (b, 2 * (n - 8) + 4, 3, s, d), out.shape
    np.testing.assert_array_equal(np.asarray(out), np.asarray(ref))

    # Sorted-stream (large-x) path, forced to exercise it at small shape.
    out_stream = jax.block_until_ready(recat(x, force_stream=True))
    np.testing.assert_array_equal(np.asarray(out_stream), np.asarray(ref))

    print("KERNEL_OK")
</pallas_src>

<mosaic_0001>
module attributes {stable_mosaic.version = 11 : i64} {
  func.func @_recat_staged_kernel(%arg0: i32, %arg1: memref<36xi32, #tpu.memory_space<smem>>, %arg2: memref<2x12x8x128xf32, #tpu.memory_space<vmem>>, %arg3: memref<2x9x8x128xf32, #tpu.memory_space<vmem>>) attributes {dimension_semantics = [#tpu.dimension_semantics<arbitrary>], iteration_bounds = array<i64: 4>, scalar_prefetch = 1 : i64, scratch_operands = 0 : i64, tpu.core_type = #tpu.core_type<tc>, window_params = [{pipeline_mode = #tpu.pipeline_mode<synchronous>, transform_indices = @transform_0, window_bounds = array<i64: 2, 12, 8, 128>}, {transform_indices = @transform_1, window_bounds = array<i64: 2, 9, 8, 128>}]} {
    %c9_i32 = arith.constant 9 : i32
    %0 = arith.muli %arg0, %c9_i32 : i32
    %c0_i32 = arith.constant 0 : i32
    %1 = arith.addi %0, %c0_i32 : i32
    %2 = arith.index_cast %1 : i32 to index
    %3 = memref.load %arg1[%2] : memref<36xi32, #tpu.memory_space<smem>>
    %c0 = arith.constant 0 : index
    %4 = arith.index_cast %3 : i32 to index
    %c0_0 = arith.constant 0 : index
    %c0_1 = arith.constant 0 : index
    %5 = vector.load %arg2[%c0, %4, %c0_0, %c0_1] : memref<2x12x8x128xf32, #tpu.memory_space<vmem>>, vector<2x1x8x128xf32>
    %c0_2 = arith.constant 0 : index
    %c0_3 = arith.constant 0 : index
    %c0_4 = arith.constant 0 : index
    %c0_5 = arith.constant 0 : index
    %6 = vector.load %arg3[%c0_2, %c0_3, %c0_4, %c0_5] : memref<2x9x8x128xf32, #tpu.memory_space<vmem>>, vector<2x1x8x128xf32>
    tpu.vector_store %arg3[%c0_2, %c0_3, %c0_4, %c0_5], %5 {strides = array<i32>} : memref<2x9x8x128xf32, #tpu.memory_space<vmem>>, vector<2x1x8x128xf32>,
    %c1_i32 = arith.constant 1 : i32
    %7 = arith.addi %0, %c1_i32 : i32
    %8 = arith.index_cast %7 : i32 to index
    %9 = memref.load %arg1[%8] : memref<36xi32, #tpu.memory_space<smem>>
    %c0_6 = arith.constant 0 : index
    %10 = arith.index_cast %9 : i32 to index
    %c0_7 = arith.constant 0 : index
    %c0_8 = arith.constant 0 : index
    %11 = vector.load %arg2[%c0_6, %10, %c0_7, %c0_8] : memref<2x12x8x128xf32, #tpu.memory_space<vmem>>, vector<2x1x8x128xf32>
    %c0_9 = arith.constant 0 : index
    %c1 = arith.constant 1 : index
    %c0_10 = arith.constant 0 : index
    %c0_11 = arith.constant 0 : index
    %12 = vector.load %arg3[%c0_9, %c1, %c0_10, %c0_11] : memref<2x9x8x128xf32, #tpu.memory_space<vmem>>, vector<2x1x8x128xf32>
    tpu.vector_store %arg3[%c0_9, %c1, %c0_10, %c0_11], %11 {strides = array<i32>} : memref<2x9x8x128xf32, #tpu.memory_space<vmem>>, vector<2x1x8x128xf32>,
    %c2_i32 = arith.constant 2 : i32
    %13 = arith.addi %0, %c2_i32 : i32
    %14 = arith.index_cast %13 : i32 to index
    %15 = memref.load %arg1[%14] : memref<36xi32, #tpu.memory_space<smem>>
    %c0_12 = arith.constant 0 : index
    %16 = arith.index_cast %15 : i32 to index
    %c0_13 = arith.constant 0 : index
    %c0_14 = arith.constant 0 : index
    %17 = vector.load %arg2[%c0_12, %16, %c0_13, %c0_14] : memref<2x12x8x128xf32, #tpu.memory_space<vmem>>, vector<2x1x8x128xf32>
    %c0_15 = arith.constant 0 : index
    %c2 = arith.constant 2 : index
    %c0_16 = arith.constant 0 : index
    %c0_17 = arith.constant 0 : index
    %18 = vector.load %arg3[%c0_15, %c2, %c0_16, %c0_17] : memref<2x9x8x128xf32, #tpu.memory_space<vmem>>, vector<2x1x8x128xf32>
    tpu.vector_store %arg3[%c0_15, %c2, %c0_16, %c0_17], %17 {strides = array<i32>} : memref<2x9x8x128xf32, #tpu.memory_space<vmem>>, vector<2x1x8x128xf32>,
    %c3_i32 = arith.constant 3 : i32
    %19 = arith.addi %0, %c3_i32 : i32
    %20 = arith.index_cast %19 : i32 to index
    %21 = memref.load %arg1[%20] : memref<36xi32, #tpu.memory_space<smem>>
    %c0_18 = arith.constant 0 : index
    %22 = arith.index_cast %21 : i32 to index
    %c0_19 = arith.constant 0 : index
    %c0_20 = arith.constant 0 : index
    %23 = vector.load %arg2[%c0_18, %22, %c0_19, %c0_20] : memref<2x12x8x128xf32, #tpu.memory_space<vmem>>, vector<2x1x8x128xf32>
    %c0_21 = arith.constant 0 : index
    %c3 = arith.constant 3 : index
    %c0_22 = arith.constant 0 : index
    %c0_23 = arith.constant 0 : index
    %24 = vector.load %arg3[%c0_21, %c3, %c0_22, %c0_23] : memref<2x9x8x128xf32, #tpu.memory_space<vmem>>, vector<2x1x8x128xf32>
    tpu.vector_store %arg3[%c0_21, %c3, %c0_22, %c0_23], %23 {strides = array<i32>} : memref<2x9x8x128xf32, #tpu.memory_space<vmem>>, vector<2x1x8x128xf32>,
    %c4_i32 = arith.constant 4 : i32
    %25 = arith.addi %0, %c4_i32 : i32
    %26 = arith.index_cast %25 : i32 to index
    %27 = memref.load %arg1[%26] : memref<36xi32, #tpu.memory_space<smem>>
    %c0_24 = arith.constant 0 : index
    %28 = arith.index_cast %27 : i32 to index
    %c0_25 = arith.constant 0 : index
    %c0_26 = arith.constant 0 : index
    %29 = vector.load %arg2[%c0_24, %28, %c0_25, %c0_26] : memref<2x12x8x128xf32, #tpu.memory_space<vmem>>, vector<2x1x8x128xf32>
    %c0_27 = arith.constant 0 : index
    %c4 = arith.constant 4 : index
    %c0_28 = arith.constant 0 : index
    %c0_29 = arith.constant 0 : index
    %30 = vector.load %arg3[%c0_27, %c4, %c0_28, %c0_29] : memref<2x9x8x128xf32, #tpu.memory_space<vmem>>, vector<2x1x8x128xf32>
    tpu.vector_store %arg3[%c0_27, %c4, %c0_28, %c0_29], %29 {strides = array<i32>} : memref<2x9x8x128xf32, #tpu.memory_space<vmem>>, vector<2x1x8x128xf32>,
    %c5_i32 = arith.constant 5 : i32
    %31 = arith.addi %0, %c5_i32 : i32
    %32 = arith.index_cast %31 : i32 to index
    %33 = memref.load %arg1[%32] : memref<36xi32, #tpu.memory_space<smem>>
    %c0_30 = arith.constant 0 : index
    %34 = arith.index_cast %33 : i32 to index
    %c0_31 = arith.constant 0 : index
    %c0_32 = arith.constant 0 : index
    %35 = vector.load %arg2[%c0_30, %34, %c0_31, %c0_32] : memref<2x12x8x128xf32, #tpu.memory_space<vmem>>, vector<2x1x8x128xf32>
    %c0_33 = arith.constant 0 : index
    %c5 = arith.constant 5 : index
    %c0_34 = arith.constant 0 : index
    %c0_35 = arith.constant 0 : index
    %36 = vector.load %arg3[%c0_33, %c5, %c0_34, %c0_35] : memref<2x9x8x128xf32, #tpu.memory_space<vmem>>, vector<2x1x8x128xf32>
    tpu.vector_store %arg3[%c0_33, %c5, %c0_34, %c0_35], %35 {strides = array<i32>} : memref<2x9x8x128xf32, #tpu.memory_space<vmem>>, vector<2x1x8x128xf32>,
    %c6_i32 = arith.constant 6 : i32
    %37 = arith.addi %0, %c6_i32 : i32
    %38 = arith.index_cast %37 : i32 to index
    %39 = memref.load %arg1[%38] : memref<36xi32, #tpu.memory_space<smem>>
    %c0_36 = arith.constant 0 : index
    %40 = arith.index_cast %39 : i32 to index
    %c0_37 = arith.constant 0 : index
    %c0_38 = arith.constant 0 : index
    %41 = vector.load %arg2[%c0_36, %40, %c0_37, %c0_38] : memref<2x12x8x128xf32, #tpu.memory_space<vmem>>, vector<2x1x8x128xf32>
    %c0_39 = arith.constant 0 : index
    %c6 = arith.constant 6 : index
    %c0_40 = arith.constant 0 : index
    %c0_41 = arith.constant 0 : index
    %42 = vector.load %arg3[%c0_39, %c6, %c0_40, %c0_41] : memref<2x9x8x128xf32, #tpu.memory_space<vmem>>, vector<2x1x8x128xf32>
    tpu.vector_store %arg3[%c0_39, %c6, %c0_40, %c0_41], %41 {strides = array<i32>} : memref<2x9x8x128xf32, #tpu.memory_space<vmem>>, vector<2x1x8x128xf32>,
    %c7_i32 = arith.constant 7 : i32
    %43 = arith.addi %0, %c7_i32 : i32
    %44 = arith.index_cast %43 : i32 to index
    %45 = memref.load %arg1[%44] : memref<36xi32, #tpu.memory_space<smem>>
    %c0_42 = arith.constant 0 : index
    %46 = arith.index_cast %45 : i32 to index
    %c0_43 = arith.constant 0 : index
    %c0_44 = arith.constant 0 : index
    %47 = vector.load %arg2[%c0_42, %46, %c0_43, %c0_44] : memref<2x12x8x128xf32, #tpu.memory_space<vmem>>, vector<2x1x8x128xf32>
    %c0_45 = arith.constant 0 : index
    %c7 = arith.constant 7 : index
    %c0_46 = arith.constant 0 : index
    %c0_47 = arith.constant 0 : index
    %48 = vector.load %arg3[%c0_45, %c7, %c0_46, %c0_47] : memref<2x9x8x128xf32, #tpu.memory_space<vmem>>, vector<2x1x8x128xf32>
    tpu.vector_store %arg3[%c0_45, %c7, %c0_46, %c0_47], %47 {strides = array<i32>} : memref<2x9x8x128xf32, #tpu.memory_space<vmem>>, vector<2x1x8x128xf32>,
    %c8_i32 = arith.constant 8 : i32
    %49 = arith.addi %0, %c8_i32 : i32
    %50 = arith.index_cast %49 : i32 to index
    %51 = memref.load %arg1[%50] : memref<36xi32, #tpu.memory_space<smem>>
    %c0_48 = arith.constant 0 : index
    %52 = arith.index_cast %51 : i32 to index
    %c0_49 = arith.constant 0 : index
    %c0_50 = arith.constant 0 : index
    %53 = vector.load %arg2[%c0_48, %52, %c0_49, %c0_50] : memref<2x12x8x128xf32, #tpu.memory_space<vmem>>, vector<2x1x8x128xf32>
    %c0_51 = arith.constant 0 : index
    %c8 = arith.constant 8 : index
    %c0_52 = arith.constant 0 : index
    %c0_53 = arith.constant 0 : index
    %54 = vector.load %arg3[%c0_51, %c8, %c0_52, %c0_53] : memref<2x9x8x128xf32, #tpu.memory_space<vmem>>, vector<2x1x8x128xf32>
    tpu.vector_store %arg3[%c0_51, %c8, %c0_52, %c0_53], %53 {strides = array<i32>} : memref<2x9x8x128xf32, #tpu.memory_space<vmem>>, vector<2x1x8x128xf32>,
    return
  }
  func.func @transform_0(%arg0: i32, %arg1: memref<36xi32, #tpu.memory_space<smem>>) -> (i32, i32, i32, i32) {
    %c0_i32 = arith.constant 0 : i32
    %c0_i32_0 = arith.constant 0 : i32
    %c0_i32_1 = arith.constant 0 : i32
    %c0_i32_2 = arith.constant 0 : i32
    %c0_i32_3 = arith.constant 0 : i32
    return %c0_i32, %c0_i32_0, %c0_i32_1, %c0_i32_2 : i32, i32, i32, i32
  }
  func.func @transform_1(%arg0: i32, %arg1: memref<36xi32, #tpu.memory_space<smem>>) -> (i32, i32, i32, i32) {
    %c0_i32 = arith.constant 0 : i32
    %c0_i32_0 = arith.constant 0 : i32
    %c0_i32_1 = arith.constant 0 : i32
    %c0_i32_2 = arith.constant 0 : i32
    return %c0_i32, %arg0, %c0_i32_0, %c0_i32_1 : i32, i32, i32, i32
  }
}

</mosaic_0001>

<bundles_post_ra>
// kernel: tpu_custom_call.1
= control target key start
LH: loop header
LB: loop body
LE: loop exit
PB: predicated region body
PF: predicated region fallthrough
CT: control target
= control target key end

     0   :  { %s703_s0 = inlined_call_operand.hbm [shape: s32[36], index: 0, kind: input, shape index: {}]   ;;  %s704_s1 = inlined_call_operand.hbm [shape: f32[2,12,8,128], index: 1, kind: input, shape index: {}]   ;;  %s705_s2 = inlined_call_operand.hbm [shape: f32[2,36,8,128], index: 2, kind: output, shape index: {}]  }
   0x1   :  { %s420_s11 = scalar_lea.hbm %s703_s0, 16 }
   0x2   :  { %p421_p0 = scmp.ne.s32.totalorder %s703_s0, %s420_s11  ;;  %p424_p1 = scmp.lt.u32.totalorder %s420_s11, %s703_s0 }
   0x4   :  { %p426_p2 = pnand %p424_p1, %p421_p0 }
   0x6   :  { %429 = shalt.err (!%p426_p2)  }
   0x7   :  { %s500_s16 = smov [#allocation3]  }
   0x8   :  { %8 = dma.hbm_to_smem %s703_s0, 16, %s500_s16, [#allocation2] }
   0x9   :  { %474 = dma.done.wait [#allocation2], 16 }
   0xa   :  { %475 = vsyncadd [#allocation2], 4294967280 }
   0xb   :  { %10 = sfence }
   0xc   :  { %11 = vsyncpa [#allocation5], 0 }
   0xd   :  { %12 = vsyncpa [#allocation6], 0 }
   0xe   :  { %14 = vsyncpa [#allocation6 + $0x1], 0  ;;  %s538_s19 = smov 0   ;;  %s540_s20 = smov 0  }
   0xf   :  { %s542_s21 = smov 0   ;;  %s544_s22 = smov 0  }
  0x10 LB: > { %s559_s0 = sadd.s32 4294967295, %s498_s22   ;;  %s319_s23 = sadd.s32 4294967294, %s498_s22   ;;  %s498_s22 = sphi %s544_s22, %s721_s22   ;;  %s494_s21 = sphi %s542_s21, %s720_s21   ;;  %s490_s20 = sphi %s540_s20, %s719_s20   ;;  %s486_s19 = sphi %s538_s19, %s718_s19  }
  0x11   : > { %s563_s24 = sadd.s32 1, %s498_s22   ;;  %s48_s25 = sadd.s32 1, %s494_s21 }
  0x12   : > { %s45_s26 = ssub.s32 %s498_s22, %s563_s24  ;;  %p58_p3 = scmp.ne.s32.totalorder %s494_s21, %s490_s20 }
  0x13   : > { %p46_p4 = scmp.eq.s32.totalorder %s45_s26, 0  ;;  %p59_p5 = scmp.eq.s32.totalorder %s559_s0, 3 }
  0x14   : > { %p64_p6 = scmp.ne.s32.totalorder %s490_s20, %s486_s19  ;;  %p65_p7 = scmp.eq.s32.totalorder %s319_s23, 3 }
  0x15   : > { %s574_s27 = scalar_select %p46_p4, %s494_s21, %s48_s25  }
  0x16   : > { %p576_p8 = por %p59_p5, %p58_p3  ;;  %p580_p9 = por %p65_p7, %p64_p6 }
  0x17   : > { %p320_p10 = scmp.ge.s32.totalorder %s498_s22, 1  ;;  %p72_p11 = scmp.lt.s32.totalorder %s498_s22, 5 }
  0x18   : > { %s709_s28 = scalar_select %p576_p8, 1, 0 }
  0x19   : > { %s710_s29 = scalar_select %p580_p9, 1, 0 }
  0x1a   : > { %p706_p12 = scmp.eq.s32.totalorder %s559_s0, 0  ;;  %p587_p13 = pnand %p320_p10, %p72_p11 }
  0x1b   : > { %s501_s3 = smov [#allocation4]   ;;  %s430_s8 = scalar_lea.hbm %s704_s1, 3072 }
  0x1c   : > { %s711_s30 = scalar_select %p587_p13, 1, 0 }
  0x1d   : > { %s84_s4 = sshll.u32 %s501_s3, 4  ;;  %p366_p0 = pneg %p587_p13  ;;  %s85_s4 = int_to_ptr.vmem [resolvable:$true] %s84_s4 }
  0x1e   : > { %p431_p2 = scmp.ne.s32.totalorder %s704_s1, %s430_s8  ;;  %p437_p6 = scmp.lt.u32.totalorder %s430_s8, %s704_s1 }
  0x1f   : > { %p595_p1 = pnand %p706_p12, %p366_p0 }
  0x21   : > { %p432_p3 = pneg %p595_p1 }
  0x23   : > { %p433_p4 = pnand %p432_p3, %p431_p2 }
  0x25   : > { %p434_p5 = pneg %p433_p4 }
  0x27   : > { %p439_p7 = pnand %p437_p6, %p434_p5 }
  0x29   : > { %442 = shalt.err (!%p439_p7)
}
  0x2a   : > { %s443_s13 = scalar_lea.vmem %s85_s4, 3072  ;;  %p451_p12 = scmp.lt.s32.totalorder %s85_s4, %s85_s4 }
  0x2b   : > { %p444_p10 = scmp.ne.s32.totalorder %s85_s4, %s443_s13  ;;  %p452_p9 = scmp.lt.s32.totalorder %s443_s13, %s443_s13 }
  0x2d   : > { %p446_p11 = pnand %p444_p10, %p432_p3  ;;  %p453_p8 = por %p452_p9, %p451_p12 }
  0x2f   : > { %p447_p0 = pneg %p446_p11 }
  0x31   : > { %p454_p13 = pnand %p453_p8, %p447_p0 }
  0x33   : > { %457 = shalt.err (!%p454_p13)
}
  0x34   : > { %s502_s14 = smov 128   ;;  %s503_s15 = smov 8  }
  0x35   : > { %369 = dma.hbm_to_vmem [thread:$0]  (!%p595_p1), %s704_s1, 3072, %s85_s4, [#allocation5], %s502_s14, %s502_s14, %s503_s15  }
  0x36   : > { %p713_p2 = scmp.ne.s32.totalorder %s711_s30, 0 }
  0x37   : > { %p714_p4 = scmp.eq.s32.totalorder (!%p713_p2), %s559_s0, 0 }
  0x38   : > { %100 = sbr.rel (%p713_p2) target bundleno = 103 (0x67), region = 24 }
  0x3f   : > { %477 = dma.done.wait (%p714_p4), [#allocation5], 3072   ;;  %p715_p3 = pmov %p714_p4 }
  0x40   : > { %s112_s18 = sand.u32 1, %s490_s20   ;;  %s623_s23 = smul.u32 9, %s559_s0 }
  0x41   : > { %479 = vsyncadd (%p715_p3), [#allocation5], 4294964224  ;;  %s353_s25 = smul.u32 144, %s112_s18 }
  0x42   : > { %s117_s26 = sld [smem:[#allocation3 + %s623_s23]]  ;;  %s124_s30 = sadd.s32 1, %s623_s23 }
  0x43   : > { %s125_s3 = sld [smem:[#allocation3 + %s124_s30]]  ;;  %s133_s4 = sadd.s32 2, %s623_s23 }
  0x44   : > { %s142_s5 = sadd.s32 3, %s623_s23  ;;  %s134_s6 = sld [smem:[#allocation3 + %s133_s4]] }
  0x45   : > { %s143_s7 = sld [smem:[#allocation3 + %s142_s5]]  ;;  %s151_s8 = sadd.s32 4, %s623_s23 }
  0x46   : > { %s160_s9 = sadd.s32 5, %s623_s23  ;;  %s633_s10 = sld [smem:[#allocation3 + %s151_s8]] }
  0x47   : > { %s635_s11 = sld [smem:[#allocation3 + %s160_s9]]  ;;  %s169_s13 = sadd.s32 6, %s623_s23 }
  0x48   : > { %s324_s12 = sshll.u32 %s117_s26, 3  ;;  %s638_s16 = sld [smem:[#allocation3 + %s169_s13]] }
  0x49   : > { %s325_s14 = sshll.u32 %s125_s3, 3  ;;  %s119_s15 = scalar_lea.vmem [#allocation4], %s324_s12 }
  0x4a   : > { %v120_v0 = vld [vmem:[%s119_s15] sm:$0xff]  ;;  %s640_s17 = scalar_lea.vmem [#allocation7], %s353_s25  ;;  %s127_s26 = scalar_lea.vmem [#allocation4], %s325_s14 }
  0x4b   : > { %v121_v1 = vld [vmem:[%s119_s15 + $0x60] sm:$0xff]  ;;  %122 = vst [vmem:[%s640_s17] sm:$0xff] %v120_v0  ;;  %s328_s30 = sshll.u32 %s134_s6, 3  ;;  %s331_s3 = sshll.u32 %s143_s7, 3 }
  0x4c   : > { %123 = vst [vmem:[%s640_s17 + $0x48] sm:$0xff] %v121_v1  ;;  %v128_v2 = vld [vmem:[%s127_s26] sm:$0xff]  ;;  %s136_s25 = scalar_lea.vmem [#allocation4], %s328_s30  ;;  %s145_s4 = scalar_lea.vmem [#allocation4], %s331_s3 }
  0x4d   : > { %v129_v3 = vld [vmem:[%s127_s26 + $0x60] sm:$0xff]  ;;  %326 = vst [vmem:[%s640_s17 + $0x8] sm:$0xff] %v128_v2  ;;  %s334_s5 = sshll.u32 %s633_s10, 3  ;;  %s337_s8 = sshll.u32 %s635_s11, 3 }
  0x4e   : > { %327 = vst [vmem:[%s640_s17 + $0x50] sm:$0xff] %v129_v3  ;;  %v137_v4 = vld [vmem:[%s136_s25] sm:$0xff]  ;;  %s154_s6 = scalar_lea.vmem [#allocation4], %s334_s5  ;;  %s163_s7 = scalar_lea.vmem [#allocation4], %s337_s8 }
  0x4f   : > { %v138_v5 = vld [vmem:[%s136_s25 + $0x60] sm:$0xff]  ;;  %329 = vst [vmem:[%s640_s17 + $0x10] sm:$0xff] %v137_v4  ;;  %s178_s9 = sadd.s32 7, %s623_s23  ;;  %s187_s12 = sadd.s32 8, %s623_s23 }
  0x50   : > { %v146_v6 = vld [vmem:[%s145_s4] sm:$0xff]  ;;  %330 = vst [vmem:[%s640_s17 + $0x58] sm:$0xff] %v138_v5  ;;  %s340_s10 = sshll.u32 %s638_s16, 3  ;;  %s179_s11 = sld [smem:[#allocation3 + %s178_s9]] }
  0x51   : > { %332 = vst [vmem:[%s640_s17 + $0x18] sm:$0xff] %v146_v6  ;;  %v147_v7 = vld [vmem:[%s145_s4 + $0x60] sm:$0xff]  ;;  %s188_s13 = sld [smem:[#allocation3 + %s187_s12]]  ;;  %s172_s14 = scalar_lea.vmem [#allocation4], %s340_s10 }
  0x52   : > { %333 = vst [vmem:[%s640_s17 + $0x60] sm:$0xff] %v147_v7  ;;  %v155_v8 = vld [vmem:[%s154_s6] sm:$0xff]  ;;  %s197_s16 = scalar_lea.sflag [#allocation6], %s112_s18 }
  0x53   : > { %v156_v9 = vld [vmem:[%s154_s6 + $0x60] sm:$0xff]  ;;  %335 = vst [vmem:[%s640_s17 + $0x20] sm:$0xff] %v155_v8 }
  0x54   : > { %v164_v10 = vld [vmem:[%s163_s7] sm:$0xff]  ;;  %336 = vst [vmem:[%s640_s17 + $0x68] sm:$0xff] %v156_v9 }
  0x55   : > { %338 = vst [vmem:[%s640_s17 + $0x28] sm:$0xff] %v164_v10  ;;  %v165_v11 = vld [vmem:[%s163_s7 + $0x60] sm:$0xff] }
  0x56   : > { %339 = vst [vmem:[%s640_s17 + $0x70] sm:$0xff] %v165_v11  ;;  %v173_v12 = vld [vmem:[%s172_s14] sm:$0xff]  ;;  %s343_s15 = sshll.u32 %s179_s11, 3 }
  0x57   : > { %v174_v13 = vld [vmem:[%s172_s14 + $0x60] sm:$0xff]  ;;  %341 = vst [vmem:[%s640_s17 + $0x30] sm:$0xff] %v173_v12  ;;  %s346_s23 = sshll.u32 %s188_s13, 3  ;;  %s181_s26 = scalar_lea.vmem [#allocation4], %s343_s15 }
  0x58   : > { %342 = vst [vmem:[%s640_s17 + $0x78] sm:$0xff] %v174_v13  ;;  %v182_v14 = vld [vmem:[%s181_s26] sm:$0xff]  ;;  %s190_s30 = scalar_lea.vmem [#allocation4], %s346_s23 }
  0x59   : > { %v183_v15 = vld [vmem:[%s181_s26 + $0x60] sm:$0xff]  ;;  %344 = vst [vmem:[%s640_s17 + $0x38] sm:$0xff] %v182_v14 }
  0x5a   : > { %345 = vst [vmem:[%s640_s17 + $0x80] sm:$0xff] %v183_v15  ;;  %v191_v16 = vld [vmem:[%s190_s30] sm:$0xff] }
  0x5b   : > { %v192_v17 = vld [vmem:[%s190_s30 + $0x60] sm:$0xff]  ;;  %347 = vst [vmem:[%s640_s17 + $0x40] sm:$0xff] %v191_v16 }
  0x5c   : > { %348 = vst [vmem:[%s640_s17 + $0x88] sm:$0xff] %v192_v17 }
  0x5d   : > { %s352_s3 = smul.u32 1152, %s559_s0  ;;  %s226_s25 = sshll.u32 %s640_s17, 4  ;;  %s227_s25 = int_to_ptr.vmem [resolvable:$true] %s226_s25 }
  0x5e   : > { %s504_s6 = smov 1152   ;;  %p716_p8 = scmp.ne.s32.totalorder %s709_s28, 0 }
  0x5f   : > { %s209_s8 = scalar_lea.hbm %s705_s2, %s352_s3  ;;  %s505_s18 = smov 4608  }
  0x60   : > { %358 = sst [smem:[#allocation9]] (%p716_p8), %s504_s6  ;;  %s506_s7 = smov 9  }
  0x61   : > { %359 = sst [smem:[#allocation9 + $0x1]] (%p716_p8), %s505_s18  ;;  %s507_s9 = smov 128  }
  0x62   : > { %360 = sst [smem:[#allocation9 + $0x2]] (%p716_p8), %s506_s7  ;;  %s508_s0 = smov 8  }
  0x63   : > { %361 = sst [smem:[#allocation9 + $0x3]] (%p716_p8), %s507_s9  ;;  %s509_s17 = smov [#allocation8]  }
  0x64   : > { %362 = sst [smem:[#allocation9 + $0x4]] (%p716_p8), %s507_s9  ;;  %s510_s12 = smov 0  }
  0x65   : > { %363 = sst [smem:[#allocation9 + $0x5]] (%p716_p8), %s508_s0 }
  0x66   : > { %364 = dma.general (%p716_p8), %s227_s25, 2304, %s209_s8, %s197_s16, %s509_s17, [#allocation9], %s510_s12, 0  }
  0x67 PF: > { %p376_p9 = scmp.ge.s32.totalorder %s498_s22, 2  ;;  %s254_s10 = sand.u32 1, %s486_s19  }
  0x68   : > { %p717_p12 = scmp.ne.s32.totalorder %s710_s29, 0  ;;  %s255_s11 = scalar_lea.sflag [#allocation6], %s254_s10 }
  0x6a   : > { %p371_p13 = pnand %p376_p9, %p717_p12 }
  0x6c   : > { %481 = dma.done.wait (!%p371_p13), %s255_s11, 2304  }
  0x6d   : > { %483 = vsyncadd (!%p371_p13), %s255_s11, 4294964992  ;;  %p17_p1 = scmp.ge.s32.totalorder %s563_s24, 6   ;;  %s718_s19 = smov %s490_s20 }
  0x6e   : > { %s719_s20 = smov %s494_s21  ;;  %s720_s21 = smov %s574_s27 }
  0x6f   : > { %s721_s22 = smov %s563_s24  ;;  %19 = sbr.rel (!%p17_p1) target bundleno = 16 (0x10), region = 83 }
  0x76   :  { %260 = vsyncpa [#allocation5], 1 }
  0x77   :  { %262 = vsyncpa [#allocation5 + $0x1], 1 }
  0x78   :  { %263 = vsyncpa [#allocation6], 1 }
  0x79   :  { %265 = vsyncpa [#allocation6 + $0x1], 1 }

</bundles_post_ra>
